<compile_context>
chip_gen: v7x
topology: tpu7x:2x2x1
jax: 0.10.0
libtpu: 0.0.40
codegen_flags: <defaults>
</compile_context>

<pallas_src>
import functools

import jax
import jax.numpy as jnp
from jax.experimental import pallas as pl
from jax.experimental.pallas import tpu as pltpu

# ----------------------- small, deterministic "BERT" config ------------------
# (real module uses BERT_HIDDEN_SIZE=768; small shapes per instructions)
VOCAB_SIZE = 128
HIDDEN = 32
N_LAYERS = 2
N_HEADS = 2
HEAD_DIM = HIDDEN // N_HEADS
INTERMEDIATE = 64
MAX_POS = 64
N_SENTIMENT_CLASSES = 5
LN_EPS = 1e-12
HEAD_PAD = 128   # lane-dense classifier output width (multiple of 128)


def _layernorm(x, gamma, beta, eps):
    mu = jnp.mean(x, axis=-1, keepdims=True)
    var = jnp.mean(jnp.square(x - mu), axis=-1, keepdims=True)
    return (x - mu) * jax.lax.rsqrt(var + eps) * gamma + beta


# ----------------------------- Pallas kernels --------------------------------
def _embed_ln_kernel(x_ref, g_ref, b_ref, o_ref, *, eps):
    # Embedding LayerNorm (no residual). Block = (1, S, H) per batch element.
    o_ref[0] = _layernorm(x_ref[0], g_ref[...], b_ref[...], eps)


def embed_layernorm(x, gamma, beta, eps=LN_EPS):
    B, S, H = x.shape
    return pl.pallas_call(
        functools.partial(_embed_ln_kernel, eps=eps),
        out_shape=jax.ShapeDtypeStruct((B, S, H), jnp.float32),
        grid=(B,),
        in_specs=[
            pl.BlockSpec((1, S, H), lambda b: (b, 0, 0)),
            pl.BlockSpec((1, H), lambda b: (0, 0)),
            pl.BlockSpec((1, H), lambda b: (0, 0)),
        ],
        out_specs=pl.BlockSpec((1, S, H), lambda b: (b, 0, 0)),
        compiler_params=pltpu.CompilerParams(dimension_semantics=("parallel",)),
    )(x, gamma.reshape(1, H), beta.reshape(1, H))


def _encoder_layer_kernel(x_ref, mask_ref, wqkv_ref, bqkv_ref, ao_w_ref, ao_b_ref,
                          ln1_g_ref, ln1_b_ref, i_w_ref, i_b_ref, o_w_ref, o_b_ref,
                          ln2_g_ref, ln2_b_ref, o_ref, *, n_heads, scale, eps):
    """One full BERT encoder layer for one batch element.

    x_ref:    (1, S, H) f32        mask_ref: (1, 1, S) additive mask (f32)
    wqkv_ref: (3*n_heads, H, HD) bf16   (order: [q_h0,k_h0,v_h0, q_h1,...])
    bqkv_ref: (3*n_heads, 1, HD) f32
    ao_w_ref: (n_heads, HD, H) bf16
    """
    x = x_ref[0]                                   # (S, H) f32
    mask = mask_ref[0]                             # (1, S) additive mask
    x_bf = x.astype(jnp.bfloat16)

    # --- fused multi-head self-attention (all heads, one kernel) ---
    attn = jnp.zeros(x.shape, jnp.float32)
    for h in range(n_heads):
        q = jnp.dot(x_bf, wqkv_ref[3 * h + 0],
                    preferred_element_type=jnp.float32) + bqkv_ref[3 * h + 0]
        k = jnp.dot(x_bf, wqkv_ref[3 * h + 1],
                    preferred_element_type=jnp.float32) + bqkv_ref[3 * h + 1]
        v = jnp.dot(x_bf, wqkv_ref[3 * h + 2],
                    preferred_element_type=jnp.float32) + bqkv_ref[3 * h + 2]
        # scores = q @ k^T (bf16 MXU operands, f32 accumulation)
        s = jax.lax.dot_general(
            q.astype(jnp.bfloat16), k.astype(jnp.bfloat16),
            (((1,), (1,)), ((), ())),
            preferred_element_type=jnp.float32) * scale + mask          # (S, S)
        s = s - jnp.max(s, axis=-1, keepdims=True)
        p = jnp.exp(s)                                                  # f32 softmax
        p = p * pl.reciprocal(jnp.sum(p, axis=-1, keepdims=True), approx=True)
        ctx = jnp.dot(p.astype(jnp.bfloat16), v.astype(jnp.bfloat16),
                      preferred_element_type=jnp.float32)               # (S, HD)
        # per-head slice of the output projection: sum_h ctx_h @ W_o[h]
        attn = attn + jnp.dot(ctx.astype(jnp.bfloat16), ao_w_ref[h],
                              preferred_element_type=jnp.float32)       # (S, H)
    attn = attn + ao_b_ref[...]

    # residual + LayerNorm 1 (f32)
    h1 = _layernorm(attn + x, ln1_g_ref[...], ln1_b_ref[...], eps)

    # --- feed-forward ---
    inter = jnp.dot(h1.astype(jnp.bfloat16), i_w_ref[...],
                    preferred_element_type=jnp.float32) + i_b_ref[...]
    # TODO(synk): PyTorch BERT uses exact (erf) GELU; tanh approximation is used
    # here for an EUP-friendly TPU lowering.
    inter = jax.nn.gelu(inter, approximate=True)
    ffn = jnp.dot(inter.astype(jnp.bfloat16), o_w_ref[...],
                  preferred_element_type=jnp.float32) + o_b_ref[...]

    # residual + LayerNorm 2 (f32)
    o_ref[0] = _layernorm(ffn + h1, ln2_g_ref[...], ln2_b_ref[...], eps)


def encoder_layer(x, add_mask, lp):
    """x: (B,S,H) f32; add_mask: (B,1,S) additive mask; lp: packed layer params."""
    B, S, H = x.shape
    scale = 1.0 / float(HEAD_DIM) ** 0.5

    def full(shape):
        return pl.BlockSpec(shape, lambda b, n=len(shape): (0,) * n)

    return pl.pallas_call(
        functools.partial(_encoder_layer_kernel,
                          n_heads=N_HEADS, scale=scale, eps=LN_EPS),
        out_shape=jax.ShapeDtypeStruct((B, S, H), jnp.float32),
        grid=(B,),
        in_specs=[
            pl.BlockSpec((1, S, H), lambda b: (b, 0, 0)),        # x
            pl.BlockSpec((1, 1, S), lambda b: (b, 0, 0)),        # additive mask
            full((3 * N_HEADS, H, HEAD_DIM)),                    # wqkv (bf16)
            full((3 * N_HEADS, 1, HEAD_DIM)),                    # bqkv (f32)
            full((N_HEADS, HEAD_DIM, H)),                        # ao_w (bf16)
            full((1, H)),                                        # ao_b
            full((1, H)), full((1, H)),                          # ln1 gamma/beta
            full((H, INTERMEDIATE)),                             # i_w (bf16)
            full((1, INTERMEDIATE)),                             # i_b
            full((INTERMEDIATE, H)),                             # o_w (bf16)
            full((1, H)),                                        # o_b
            full((1, H)), full((1, H)),                          # ln2 gamma/beta
        ],
        out_specs=pl.BlockSpec((1, S, H), lambda b: (b, 0, 0)),
        compiler_params=pltpu.CompilerParams(dimension_semantics=("parallel",)),
    )(x, add_mask, lp["wqkv"], lp["bqkv"], lp["ao_w"], lp["ao_b"],
      lp["ln1_g"], lp["ln1_b"], lp["i_w"], lp["i_b"], lp["o_w"], lp["o_b"],
      lp["ln2_g"], lp["ln2_b"])


def _head_kernel(x_ref, w_ref, b_ref, o_ref, *, activation):
    y = jnp.dot(x_ref[...].astype(jnp.bfloat16), w_ref[...],
                preferred_element_type=jnp.float32) + b_ref[...]
    if activation == "sigmoid5":
        y = jax.nn.sigmoid(y) * 5.0
    o_ref[...] = y


def classifier_head(pooled, w_pad, b_pad, n_out, activation="none"):
    """pooled:(B,H) f32, w_pad:(H,HEAD_PAD) bf16, b_pad:(1,HEAD_PAD) f32.

    Output stored lane-dense as (B, HEAD_PAD); the first n_out columns are the
    real logits (padding columns have zero weights/bias)."""
    B, H = pooled.shape
    out = pl.pallas_call(
        functools.partial(_head_kernel, activation=activation),
        out_shape=jax.ShapeDtypeStruct((B, HEAD_PAD), jnp.float32),
        grid=(1,),
        in_specs=[
            pl.BlockSpec((B, H), lambda i: (0, 0)),
            pl.BlockSpec((H, HEAD_PAD), lambda i: (0, 0)),
            pl.BlockSpec((1, HEAD_PAD), lambda i: (0, 0)),
        ],
        out_specs=pl.BlockSpec((B, HEAD_PAD), lambda i: (0, 0)),
    )(pooled, w_pad, b_pad)
    return out[:, :n_out]


# ------------------------ deterministic parameter init -----------------------
def _normal(key, shape, std=0.02):
    return std * jax.random.normal(key, shape, dtype=jnp.float32)


def _pack_qkv(q_w, k_w, v_w):
    # (H, H) each -> (3*N_HEADS, H, HEAD_DIM) bf16, ordered [q_h,k_h,v_h] per head
    def per_head(w):
        return w.reshape(HIDDEN, N_HEADS, HEAD_DIM).transpose(1, 0, 2)  # (NH,H,HD)
    stacked = jnp.stack([per_head(q_w), per_head(k_w), per_head(v_w)], axis=1)
    return stacked.reshape(3 * N_HEADS, HIDDEN, HEAD_DIM).astype(jnp.bfloat16)


def _pack_qkv_bias(q_b, k_b, v_b):
    def per_head(b):
        return b.reshape(N_HEADS, 1, HEAD_DIM)
    stacked = jnp.stack([per_head(q_b), per_head(k_b), per_head(v_b)], axis=1)
    return stacked.reshape(3 * N_HEADS, 1, HEAD_DIM)                     # f32


def _pad_head(w, b):
    # (H, n) / (n,) -> lane-dense (H, HEAD_PAD) bf16 and (1, HEAD_PAD) f32
    H, n = w.shape
    w_pad = jnp.zeros((H, HEAD_PAD), jnp.float32).at[:, :n].set(w).astype(jnp.bfloat16)
    b_pad = jnp.zeros((1, HEAD_PAD), jnp.float32).at[0, :n].set(b)
    return w_pad, b_pad


def init_params(seed=0):
    keys = iter(jax.random.split(jax.random.PRNGKey(seed), 256))
    p = {
        "word_emb": _normal(next(keys), (VOCAB_SIZE, HIDDEN)),
        "pos_emb": _normal(next(keys), (MAX_POS, HIDDEN)),
        "type_emb": _normal(next(keys), (2, HIDDEN)),
        "emb_ln_g": jnp.ones((HIDDEN,), jnp.float32),
        "emb_ln_b": jnp.zeros((HIDDEN,), jnp.float32),
        "layers": [],
    }
    # classifier heads (nn.Linear weights stored as (in, out)), padded lane-dense
    sent_w = _normal(next(keys), (HIDDEN, N_SENTIMENT_CLASSES))
    para_w = _normal(next(keys), (HIDDEN, 1))
    sim_w = _normal(next(keys), (HIDDEN, 1))
    p["sent_w_pad"], p["sent_b_pad"] = _pad_head(sent_w, jnp.zeros((N_SENTIMENT_CLASSES,)))
    p["para_w_pad"], p["para_b_pad"] = _pad_head(para_w, jnp.zeros((1,)))
    p["sim_w_pad"], p["sim_b_pad"] = _pad_head(sim_w, jnp.zeros((1,)))

    for _ in range(N_LAYERS):
        q_w = _normal(next(keys), (HIDDEN, HIDDEN))
        k_w = _normal(next(keys), (HIDDEN, HIDDEN))
        v_w = _normal(next(keys), (HIDDEN, HIDDEN))
        ao_w = _normal(next(keys), (HIDDEN, HIDDEN))
        i_w = _normal(next(keys), (HIDDEN, INTERMEDIATE))
        o_w = _normal(next(keys), (INTERMEDIATE, HIDDEN))
        zeros_h = jnp.zeros((HIDDEN,), jnp.float32)
        p["layers"].append({
            "wqkv": _pack_qkv(q_w, k_w, v_w),
            "bqkv": _pack_qkv_bias(zeros_h, zeros_h, zeros_h),
            "ao_w": ao_w.reshape(N_HEADS, HEAD_DIM, HIDDEN).astype(jnp.bfloat16),
            "ao_b": jnp.zeros((1, HIDDEN), jnp.float32),
            "ln1_g": jnp.ones((1, HIDDEN), jnp.float32),
            "ln1_b": jnp.zeros((1, HIDDEN), jnp.float32),
            "i_w": i_w.astype(jnp.bfloat16),
            "i_b": jnp.zeros((1, INTERMEDIATE), jnp.float32),
            "o_w": o_w.astype(jnp.bfloat16),
            "o_b": jnp.zeros((1, HIDDEN), jnp.float32),
            "ln2_g": jnp.ones((1, HIDDEN), jnp.float32),
            "ln2_b": jnp.zeros((1, HIDDEN), jnp.float32),
        })
    return p


# ------------------------------ model (JAX glue) ------------------------------
class MultitaskBERT:
    """JAX/Pallas re-implementation of the PyTorch MultitaskBERT forward pass."""

    def __init__(self, params):
        self.p = params
        # TODO(synk): GlobalContextLayer / GlobalContextLayerRegularized class
        # definitions are not provided, so add_extra_layer=True and the
        # ATTENTION pooling strategy are not implemented.

    def _bert_encode(self, input_ids, attention_mask):
        p = self.p
        B, S = input_ids.shape
        # embeddings (gather is glue; LN runs in a Pallas kernel, no residual)
        word = jnp.take(p["word_emb"], input_ids, axis=0)            # (B,S,H)
        pos = p["pos_emb"][:S][None, :, :]                           # (1,S,H)
        tok = p["type_emb"][0][None, None, :]                        # token_type_ids = 0
        x = embed_layernorm(word + pos + tok, p["emb_ln_g"], p["emb_ln_b"])

        add_mask = ((1.0 - attention_mask.astype(jnp.float32)) * -10000.0)[:, None, :]

        for lp in p["layers"]:
            x = encoder_layer(x, add_mask, lp)                       # fused layer kernel
        return x                                                     # (B, S, H)

    def forward(self, input_ids, attention_mask, pooling_strategy="cls"):
        seq_out = self._bert_encode(input_ids, attention_mask)
        if pooling_strategy == "cls":
            return seq_out[:, 0, :]
        elif pooling_strategy == "average":
            return jnp.mean(seq_out, axis=1)
        elif pooling_strategy == "max":
            return jnp.max(seq_out, axis=1)
        else:
            raise ValueError(f"Unsupported pooling strategy: {pooling_strategy}")

    def predict_sentiment(self, input_ids, attention_mask):
        pooled = self.forward(input_ids, attention_mask)             # dropout = eval identity
        return classifier_head(pooled, self.p["sent_w_pad"], self.p["sent_b_pad"],
                               N_SENTIMENT_CLASSES)                  # (B, 5)

    def predict_paraphrase(self, ids1, mask1, ids2, mask2):
        all_ids = jnp.concatenate([ids1, ids2[:, 1:]], axis=1)
        all_mask = jnp.concatenate([mask1, mask2[:, 1:]], axis=1)
        pooled = self.forward(all_ids, all_mask)
        return classifier_head(pooled, self.p["para_w_pad"], self.p["para_b_pad"], 1)

    def predict_similarity(self, ids1, mask1, ids2, mask2):
        all_ids = jnp.concatenate([ids1, ids2[:, 1:]], axis=1)
        all_mask = jnp.concatenate([mask1, mask2[:, 1:]], axis=1)
        pooled = self.forward(all_ids, all_mask)
        # sigmoid(linear(x)) * 5 fused in the head kernel
        return classifier_head(pooled, self.p["sim_w_pad"], self.p["sim_b_pad"], 1,
                               activation="sigmoid5")


# ---------------------------------- main --------------------------------------
if __name__ == "__main__":
    B, S = 2, 8
    key = jax.random.PRNGKey(0)
    k1, k2 = jax.random.split(key)

    input_ids_1 = jax.random.randint(k1, (B, S), 0, VOCAB_SIZE, dtype=jnp.int32)
    input_ids_2 = jax.random.randint(k2, (B, S), 0, VOCAB_SIZE, dtype=jnp.int32)
    attention_mask_1 = jnp.ones((B, S), jnp.int32).at[1, S - 2:].set(0)
    attention_mask_2 = jnp.ones((B, S), jnp.int32).at[0, S - 1:].set(0)

    model = MultitaskBERT(init_params(seed=0))

    sent_logits = model.predict_sentiment(input_ids_1, attention_mask_1)
    para_logit = model.predict_paraphrase(input_ids_1, attention_mask_1,
                                          input_ids_2, attention_mask_2)
    sim_score = model.predict_similarity(input_ids_1, attention_mask_1,
                                         input_ids_2, attention_mask_2)

    jax.block_until_ready((sent_logits, para_logit, sim_score))
    assert sent_logits.shape == (B, N_SENTIMENT_CLASSES)
    assert para_logit.shape == (B, 1)
    assert sim_score.shape == (B, 1)
    assert bool(jnp.all(jnp.isfinite(sent_logits)))
    assert bool(jnp.all(jnp.isfinite(para_logit)))
    assert bool(jnp.all((sim_score >= 0.0) & (sim_score <= 5.0)))
    print("KERNEL_OK")
</pallas_src>

<mosaic_0001>
module attributes {stable_mosaic.version = 11 : i64} {
  func.func @_embed_ln_kernel(%arg0: i32, %arg1: memref<1x8x32xf32, #tpu.memory_space<vmem>>, %arg2: memref<1x32xf32, #tpu.memory_space<vmem>>, %arg3: memref<1x32xf32, #tpu.memory_space<vmem>>, %arg4: memref<1x8x32xf32, #tpu.memory_space<vmem>>) attributes {dimension_semantics = [#tpu.dimension_semantics<parallel>], iteration_bounds = array<i64: 2>, scalar_prefetch = 0 : i64, scratch_operands = 0 : i64, tpu.core_type = #tpu.core_type<tc>, window_params = [{transform_indices = @transform_0, window_bounds = array<i64: 1, 8, 32>}, {pipeline_mode = #tpu.pipeline_mode<synchronous>, transform_indices = @transform_1, window_bounds = array<i64: 1, 32>}, {pipeline_mode = #tpu.pipeline_mode<synchronous>, transform_indices = @transform_2, window_bounds = array<i64: 1, 32>}, {transform_indices = @transform_3, window_bounds = array<i64: 1, 8, 32>}]} {
    %c0 = arith.constant 0 : index
    %c0_0 = arith.constant 0 : index
    %c0_1 = arith.constant 0 : index
    %0 = vector.load %arg1[%c0, %c0_0, %c0_1] : memref<1x8x32xf32, #tpu.memory_space<vmem>>, vector<1x8x32xf32>
    %1 = vector.shape_cast %0 : vector<1x8x32xf32> to vector<8x32xf32>
    %c0_2 = arith.constant 0 : index
    %c0_3 = arith.constant 0 : index
    %2 = vector.load %arg2[%c0_2, %c0_3] : memref<1x32xf32, #tpu.memory_space<vmem>>, vector<1x32xf32>
    %c0_4 = arith.constant 0 : index
    %c0_5 = arith.constant 0 : index
    %3 = vector.load %arg3[%c0_4, %c0_5] : memref<1x32xf32, #tpu.memory_space<vmem>>, vector<1x32xf32>
    %cst = arith.constant dense<0.000000e+00> : vector<8xf32>
    %4 = vector.multi_reduction <add>, %1, %cst [1] : vector<8x32xf32> to vector<8xf32>
    %5 = vector.shape_cast %4 : vector<8xf32> to vector<8x1xf32>
    %cst_6 = arith.constant 3.200000e+01 : f32
    %6 = vector.broadcast %cst_6 : f32 to vector<8x1xf32>
    %7 = arith.divf %5, %6 : vector<8x1xf32>
    %8 = vector.broadcast %7 : vector<8x1xf32> to vector<8x32xf32>
    %9 = arith.subf %1, %8 : vector<8x32xf32>
    %10 = arith.mulf %9, %9 : vector<8x32xf32>
    %cst_7 = arith.constant dense<0.000000e+00> : vector<8xf32>
    %11 = vector.multi_reduction <add>, %10, %cst_7 [1] : vector<8x32xf32> to vector<8xf32>
    %12 = vector.shape_cast %11 : vector<8xf32> to vector<8x1xf32>
    %cst_8 = arith.constant 3.200000e+01 : f32
    %13 = vector.broadcast %cst_8 : f32 to vector<8x1xf32>
    %14 = arith.divf %12, %13 : vector<8x1xf32>
    %15 = vector.broadcast %7 : vector<8x1xf32> to vector<8x32xf32>
    %16 = arith.subf %1, %15 : vector<8x32xf32>
    %cst_9 = arith.constant 9.99999996E-13 : f32
    %17 = vector.broadcast %cst_9 : f32 to vector<8x1xf32>
    %18 = arith.addf %14, %17 : vector<8x1xf32>
    %19 = math.rsqrt %18 : vector<8x1xf32>
    %20 = vector.broadcast %19 : vector<8x1xf32> to vector<8x32xf32>
    %21 = arith.mulf %16, %20 : vector<8x32xf32>
    %22 = vector.broadcast %2 : vector<1x32xf32> to vector<8x32xf32>
    %23 = arith.mulf %21, %22 : vector<8x32xf32>
    %24 = vector.broadcast %3 : vector<1x32xf32> to vector<8x32xf32>
    %25 = arith.addf %23, %24 : vector<8x32xf32>
    %c0_10 = arith.constant 0 : index
    %c0_11 = arith.constant 0 : index
    %c0_12 = arith.constant 0 : index
    %26 = vector.load %arg4[%c0_10, %c0_11, %c0_12] : memref<1x8x32xf32, #tpu.memory_space<vmem>>, vector<1x8x32xf32>
    %27 = vector.shape_cast %26 : vector<1x8x32xf32> to vector<8x32xf32>
    %28 = vector.shape_cast %25 : vector<8x32xf32> to vector<1x8x32xf32>
    tpu.vector_store %arg4[%c0_10, %c0_11, %c0_12], %28 {strides = array<i32>} : memref<1x8x32xf32, #tpu.memory_space<vmem>>, vector<1x8x32xf32>,
    return
  }
  func.func @transform_0(%arg0: i32) -> (i32, i32, i32) {
    %c0_i32 = arith.constant 0 : i32
    %c0_i32_0 = arith.constant 0 : i32
    %c0_i32_1 = arith.constant 0 : i32
    return %arg0, %c0_i32, %c0_i32_0 : i32, i32, i32
  }
  func.func @transform_1(%arg0: i32) -> (i32, i32) {
    %c0_i32 = arith.constant 0 : i32
    %c0_i32_0 = arith.constant 0 : i32
    %c0_i32_1 = arith.constant 0 : i32
    return %c0_i32, %c0_i32_0 : i32, i32
  }
  func.func @transform_2(%arg0: i32) -> (i32, i32) {
    %c0_i32 = arith.constant 0 : i32
    %c0_i32_0 = arith.constant 0 : i32
    %c0_i32_1 = arith.constant 0 : i32
    return %c0_i32, %c0_i32_0 : i32, i32
  }
  func.func @transform_3(%arg0: i32) -> (i32, i32, i32) {
    %c0_i32 = arith.constant 0 : i32
    %c0_i32_0 = arith.constant 0 : i32
    %c0_i32_1 = arith.constant 0 : i32
    return %arg0, %c0_i32, %c0_i32_0 : i32, i32, i32
  }
}

</mosaic_0001>

<bundles_post_ra>
// kernel: tpu_custom_call.1
= control target key start
LH: loop header
LB: loop body
LE: loop exit
PB: predicated region body
PF: predicated region fallthrough
CT: control target
= control target key end

     0   :  { %8 = vsyncpa [#allocation3], 0  ;;  %s655_s0 = inlined_call_operand.hbm [shape: f32[2,8,32], index: 0, kind: input, shape index: {}]   ;;  %s656_s1 = inlined_call_operand.vmem [shape: f32[1,32], index: 1, kind: input, shape index: {}]   ;;  %s657_s2 = inlined_call_operand.vmem [shape: f32[1,32], index: 2, kind: input, shape index: {}]   ;;  %s658_s3 = inlined_call_operand.hbm [shape: f32[2,8,32], index: 3, kind: output, shape index: {}]  }
   0x1   :  { %10 = vsyncpa [#allocation3 + $0x1], 0 }
   0x2   :  { %11 = vsyncpa [#allocation4], 0 }
   0x3   :  { %13 = vsyncpa [#allocation4 + $0x1], 0  ;;  %s485_s12 = smov 0   ;;  %s487_s13 = smov 0  }
   0x4   :  { %s489_s14 = smov 0   ;;  %s491_s15 = smov 0  }
   0x5 LB: > { %s506_s16 = sadd.s32 4294967295, %s461_s15   ;;  %s303_s17 = sadd.s32 4294967294, %s461_s15   ;;  %s461_s15 = sphi %s491_s15, %s673_s15   ;;  %s457_s14 = sphi %s489_s14, %s672_s14   ;;  %s453_s13 = sphi %s487_s13, %s671_s13   ;;  %s449_s12 = sphi %s485_s12, %s670_s12  }
   0x6   : > { %s510_s18 = sadd.s32 1, %s461_s15   ;;  %s26_s19 = sadd.s32 1, %s457_s14 }
   0x7   : > { %s23_s20 = ssub.s32 %s461_s15, %s510_s18  ;;  %p33_p0 = scmp.ne.s32.totalorder %s457_s14, %s453_s13 }
   0x8   : > { %p24_p1 = scmp.eq.s32.totalorder %s23_s20, 0  ;;  %p34_p2 = scmp.eq.s32.totalorder %s461_s15, 0 }
   0x9   : > { %p39_p3 = scmp.ne.s32.totalorder %s453_s13, %s449_s12  ;;  %p40_p4 = scmp.eq.s32.totalorder %s506_s16, 0 }
   0xa   : > { %s522_s21 = scalar_select %p24_p1, %s457_s14, %s26_s19  }
   0xb   : > { %p524_p5 = por %p34_p2, %p33_p0  ;;  %p528_p6 = por %p40_p4, %p39_p3 }
   0xc   : > { %p105_p7 = scmp.eq.s32.totalorder %s506_s16, 1  ;;  %p111_p8 = scmp.eq.s32.totalorder %s303_s17, 1 }
   0xd   : > { %p329_p10 = scmp.lt.s32.totalorder %s461_s15, 2  ;;  %s137_s26 = sand.u32 1, %s457_s14  }
   0xe   : > { %p535_p11 = por %p105_p7, %p33_p0  ;;  %p539_p12 = por %p111_p8, %p39_p3 }
   0xf   : > { %s307_s27 = sshll.u32 %s461_s15, 7  ;;  %s306_s28 = sshll.u32 %s137_s26, 3 }
  0x10   : > { %s662_s24 = scalar_select %p535_p11, 1, 0 }
  0x11   : > { %s663_s25 = scalar_select %p539_p12, 1, 0 }
  0x12   : > { %s548_s4 = scalar_lea.hbm %s655_s0, %s307_s27  ;;  %s141_s5 = scalar_lea.vmem [#allocation2], %s306_s28 }
  0x13   : > { %s148_s6 = sshll.u32 %s141_s5, 4  ;;  %p552_p13 = pnand %p329_p10, %p524_p5  ;;  %s556_s6 = int_to_ptr.vmem [resolvable:$true] %s148_s6 }
  0x14   : > { %s138_s8 = scalar_lea.sflag [#allocation3], %s137_s26  ;;  %s365_s9 = scalar_lea.hbm %s548_s4, 128 }
  0x15   : > { %p366_p2 = scmp.ne.s32.totalorder %s548_s4, %s365_s9  ;;  %p367_p3 = pneg %p552_p13 }
  0x16   : > { %s370_s17 = scalar_lea.hbm %s655_s0, 256  ;;  %p371_p5 = scmp.lt.u32.totalorder %s548_s4, %s655_s0 }
  0x17   : > { %p368_p4 = pnand %p367_p3, %p366_p2  ;;  %p372_p8 = scmp.lt.u32.totalorder %s370_s17, %s365_s9 }
  0x18   : > { %p374_p9 = scmp.lt.u32.totalorder %s365_s9, %s548_s4 }
  0x19   : > { %p369_p7 = pneg %p368_p4  ;;  %p373_p10 = por %p372_p8, %p371_p5 }
  0x1b   : > { %p375_p0 = por %p374_p9, %p373_p10 }
  0x1d   : > { %p376_p1 = pnand %p375_p0, %p369_p7 }
  0x1f   : > { %379 = shalt.err (!%p376_p1)
}
  0x20   : > { %s380_s22 = scalar_lea.vmem %s556_s6, 128  ;;  %s463_s26 = smov [#allocation2]  }
  0x21   : > { %p381_p2 = scmp.ne.s32.totalorder %s556_s6, %s380_s22  ;;  %s385_s27 = sshll.u32 %s463_s26, 4  ;;  %s386_s27 = int_to_ptr.vmem [resolvable:$false] %s385_s27 }
  0x22   : > { %s387_s28 = scalar_lea.vmem %s386_s27, 256  ;;  %p388_p11 = scmp.lt.s32.totalorder %s556_s6, %s386_s27 }
  0x23   : > { %p383_p4 = pnand %p381_p2, %p367_p3  ;;  %p389_p5 = scmp.lt.s32.totalorder %s387_s28, %s380_s22 }
  0x25   : > { %p384_p12 = pneg %p383_p4  ;;  %p390_p8 = por %p389_p5, %p388_p11 }
  0x27   : > { %p391_p9 = pnand %p390_p8, %p384_p12 }
  0x29   : > { %394 = shalt.err (!%p391_p9)
}
  0x2a   : > { %324 = dma.hbm_to_vmem [thread:$0]  (!%p552_p13), %s548_s4, 128, %s556_s6, %s138_s8  }
  0x2b   : > { %p665_p0 = scmp.lt.s32.totalorder %s461_s15, 3  ;;  %p666_p1 = scmp.ge.s32.totalorder %s461_s15, 1 }
  0x2d   : > { %p154_p3 = pnand %p666_p1, %p665_p0 }
  0x2e   : > { %s590_s29 = sand.u32 (!%p154_p3), 1, %s453_s13  }
  0x2f   : > { %157 = sbr.rel (%p154_p3) target bundleno = 383 (0x17f), region = 32  ;;  %s309_s30 = sshll.u32 (!%p154_p3), %s590_s29, 3 }
  0x30   : > { %s160_s5 = scalar_lea.sflag (!%p154_p3), [#allocation3], %s590_s29  ;;  %s163_s9 = scalar_lea.vmem (!%p154_p3), [#allocation2], %s309_s30 }
  0x36   : > { %440 = dma.done.wait (%p528_p6), %s160_s5, 128  }
  0x37   : > { %442 = vsyncadd (%p528_p6), %s160_s5, 4294967168  ;;  %vm189_vm0 = vcmask 261120   ;;  %v186_v0 = vld [vmem:[%s163_s9] sm:$0xff]  ;;  %s314_s8 = sshll.u32 %s506_s16, 7  ;;  %s185_s10 = scalar_lea.vmem [#allocation5], %s309_s30 }
  0x38   : > { %v190_v1 = vsel %vm189_vm0, %v186_v0, 0.0  ;;  %v311_v11 = vld [vmem:[%s656_s1] ss:$0 sm:$0xff]  ;;  %s233_s11 = sshll.u32 %s185_s10, 4  ;;  %s610_s20 = scalar_lea.hbm %s658_s3, %s314_s8  ;;  %s612_s11 = int_to_ptr.vmem [resolvable:$true] %s233_s11 }
  0x39   : > { %191 = vadd.xlane.f32.xlu0 %v190_v1  ;;  %v312_v13 = vld [vmem:[%s657_s2] ss:$0 sm:$0xff]  ;;  %s220_s22 = scalar_lea.sflag [#allocation4], %s590_s29  ;;  %s395_s26 = scalar_lea.vmem %s612_s11, 128 }
  0x3a   : > { %p396_p6 = scmp.ne.s32.totalorder %s612_s11, %s395_s26  ;;  %p667_p11 = scmp.ne.s32.totalorder %s662_s24, 0 }
  0x3b   : > { %s464_s16 = smov [#allocation5]  }
  0x3c   : > { %p397_p12 = pnand %p396_p6, %p667_p11  ;;  %s399_s27 = sshll.u32 %s464_s16, 4  ;;  %s400_s27 = int_to_ptr.vmem [resolvable:$false] %s399_s27 }
  0x3d   : > { %s401_s28 = scalar_lea.vmem %s400_s27, 256  ;;  %p402_p7 = scmp.lt.s32.totalorder %s612_s11, %s400_s27 }
  0x3e   : > { %p398_p13 = pneg %p397_p12  ;;  %p403_p10 = scmp.lt.s32.totalorder %s401_s28, %s395_s26 }
  0x40   : > { %p404_p2 = por %p403_p10, %p402_p7 }
  0x42   : > { %p405_p4 = pnand %p404_p2, %p398_p13 }
  0xc6   : > { %v192_v2 = vpop.xlane.xlu0 %191 }
  0xc7   : > { %v194_v3 = vmul.f32 0.03125, %v192_v2 }
  0xc9   : > { %v195_v4 = vsub.f32 %v186_v0, %v194_v3 }
  0xcb   : > { %v196_v5 = vmul.f32 %v195_v4, %v195_v4 }
  0xcd   : > { %v197_v6 = vsel %vm189_vm0, %v196_v5, 0.0 }
  0xce   : > { %198 = vadd.xlane.f32.xlu0 %v197_v6 }
 0x15b   : > { %v199_v7 = vpop.xlane.xlu0 %198 }
 0x15c   : > { %v200_v8 = vmul.f32 0.03125, %v199_v7 }
 0x15e   : > { %v201_v9 = vadd.f32 1e-12, %v200_v8 }
 0x160   : > { %363 = vrsqrt.f32 %v201_v9 }
 0x16a   : > { %v364_v10 = vpop.eup %363 }
 0x16b   : > { %v203_v12 = vmul.f32 %v364_v10, %v195_v4 }
 0x16d   : > { %v210_v14 = vmul.f32 %v311_v11, %v203_v12 }
 0x16f   : > { %v217_v15 = vadd.f32 %v312_v13, %v210_v14 }
 0x171   : > { %218 = vst.msk [vmem:[%s185_s10] sm:$0xff] %vm189_vm0, %v217_v15 }
 0x172   : > { %408 = shalt.err (!%p405_p4)
}
 0x173   : > { %s409_s29 = scalar_lea.hbm %s610_s20, 128  ;;  %s413_s9 = scalar_lea.hbm %s658_s3, 256 }
 0x174   : > { %p410_p5 = scmp.ne.s32.totalorder %s610_s20, %s409_s29  ;;  %p414_p0 = scmp.lt.u32.totalorder %s610_s20, %s658_s3 }
 0x175   : > { %p415_p1 = scmp.lt.u32.totalorder %s413_s9, %s409_s29  ;;  %p417_p6 = scmp.lt.u32.totalorder %s409_s29, %s610_s20 }
 0x176   : > { %p411_p8 = pnand %p410_p5, %p667_p11 }
 0x177   : > { %p416_p3 = por %p415_p1, %p414_p0 }
 0x178   : > { %p412_p9 = pneg %p411_p8 }
 0x179   : > { %p418_p12 = por %p417_p6, %p416_p3 }
 0x17b   : > { %p419_p13 = pnand %p418_p12, %p412_p9 }
 0x17d   : > { %422 = shalt.err (!%p419_p13)
}
 0x17e   : > { %319 = dma.vmem_to_hbm [thread:$0]  (%p667_p11), %s612_s11, 128, %s610_s20, %s220_s22  }
 0x17f PF: > { %s245_s6 = sand.u32 1, %s449_s12   ;;  %p668_p7 = scmp.ne.s32.totalorder %s663_s25, 0 }
 0x180   : > { %p669_p10 = scmp.ge.s32.totalorder %s461_s15, 2  ;;  %s246_s7 = scalar_lea.sflag [#allocation4], %s245_s6 }
 0x182   : > { %p326_p2 = pnand %p669_p10, %p668_p7 }
 0x184   : > { %444 = dma.done.wait (!%p326_p2), %s246_s7, 128  }
 0x185   : > { %446 = vsyncadd (!%p326_p2), %s246_s7, 4294967168  ;;  %p16_p4 = scmp.ge.s32.totalorder %s510_s18, 4   ;;  %s670_s12 = smov %s453_s13 }
 0x186   : > { %s671_s13 = smov %s457_s14  ;;  %s672_s14 = smov %s522_s21 }
 0x187   : > { %s673_s15 = smov %s510_s18  ;;  %18 = sbr.rel (!%p16_p4) target bundleno = 5 (0x5), region = 77 }
 0x18e   :  { %251 = vsyncpa [#allocation3], 1 }
 0x18f   :  { %253 = vsyncpa [#allocation3 + $0x1], 1 }
 0x190   :  { %254 = vsyncpa [#allocation4], 1 }
 0x191   :  { %256 = vsyncpa [#allocation4 + $0x1], 1 }

</bundles_post_ra>
